<compile_context>
chip_gen: v5e
topology: v5e:2x2
jax: 0.10.0
libtpu: 0.0.40
codegen_flags: <defaults>
</compile_context>

<pallas_src>
import functools
import math

import jax
import jax.numpy as jnp
from jax.experimental import pallas as pl
from jax.experimental.pallas import tpu as pltpu


# Sized for the smallest-VMEM generation (v7x: 64 MiB physical, 32 MiB scoped
# default).  Toy blocks here use < 1 MiB; at ViT-B scale re-derive tiles so
# 2x(streamed block) + weights <= ~28-30 MiB.
_VMEM_LIMIT_BYTES = 32 * 1024 * 1024


def _round_up(x, m):
    return (x + m - 1) // m * m


def _pick_block_batch(batch, rows_per_item, target_rows=256):
    """How many batch items to fold into one grid step.

    Targets >= `target_rows` GEMM-M rows per step (256 fills the v6e/v7x
    256x256 MXU; 128 already saturates v5e's 128x128 array --
    TODO(synk): make this generation-conditional via pltpu.get_tpu_info()),
    while keeping at least two grid steps so both v7x TensorCores get work,
    requiring bb | batch (full-extent blocks, no dropped tails) and keeping bb
    sublane friendly (1 or a multiple of 8).
    """
    cap = batch // 2 if batch >= 2 else batch
    bb = 1
    for d in range(1, cap + 1):
        if batch % d == 0 and (d == 1 or d % 8 == 0):
            bb = d
            if d * rows_per_item >= target_rows:
                break
    return bb


# ----------------------------------------------------------------------------
# Pallas kernels
# ----------------------------------------------------------------------------
def _image_head_kernel(x_ref, w1_ref, b1_ref, w2_ref, b2_ref, o_ref,
                       *, normalize):
    """bb images per grid step; fully fused image head.

    x_ref:  (bb, T, Kp) bf16 im2col patches (K zero-padded to a 128 multiple)
    w1_ref: (Kp, H) bf16 patch-embed weight    b1_ref: (1, H) f32
    w2_ref: (H, E)  bf16 projection weight     b2_ref: (1, E) f32
    o_ref:  (bb, E) f32 pooled/projected (optionally L2-normalized) embeddings
    """
    bb, T, Kp = x_ref.shape
    H = w1_ref.shape[1]

    # Patchify-conv as one big GEMM with M = bb*T rows (bf16 operands, f32
    # MXU accumulation).
    x = x_ref[...].reshape(bb * T, Kp)
    h = jnp.dot(x, w1_ref[...], preferred_element_type=jnp.float32) + b1_ref[...]
    # TODO(synk): PyTorch nn.GELU() defaults to the exact erf form; tanh
    # approximation kept here (backbone internals are a stand-in anyway).
    h = jax.nn.gelu(h, approximate=True)                    # (bb*T, H) f32

    # Mean-pool over patches as an XLU sublane reduce (keeps the MXU free).
    pooled = jnp.mean(h.reshape(bb, T, H), axis=1)          # (bb, H) f32

    # Projection GEMM with M = bb rows.
    y = jnp.dot(pooled.astype(jnp.bfloat16), w2_ref[...],
                preferred_element_type=jnp.float32) + b2_ref[...]   # (bb, E)

    if normalize:
        # F.normalize(dim=-1, eps=1e-12): x / max(||x||, eps)
        #   == x * rsqrt(max(||x||^2, eps^2))   (rsqrt -> EUP slot)
        sumsq = jnp.sum(y * y, axis=-1, keepdims=True)
        y = y * jax.lax.rsqrt(jnp.maximum(sumsq, 1e-24))

    o_ref[...] = y.astype(o_ref.dtype)


def _text_head_kernel(emb_ref, pos_ref, pool_ref, w_ref, b_ref, o_ref,
                      *, normalize):
    """bb sequences per grid step; fused text head.

    emb_ref:  (bb, S, W) bf16 gathered token embeddings
    pos_ref:  (S, W) f32 positional embeddings
    pool_ref: (bb, S) f32 pooling weights (EOT one-hot, as in CLIP text towers)
    w_ref:    (W, E) bf16 projection weight    b_ref: (1, E) f32
    o_ref:    (bb, E) f32
    """
    x = emb_ref[...].astype(jnp.float32) + pos_ref[...][None, :, :]    # (bb,S,W)

    # Weighted pooling (EOT one-hot) as a VPU multiply + XLU reduce.
    pooled = jnp.sum(x * pool_ref[...][:, :, None], axis=1)            # (bb, W)

    y = jnp.dot(pooled.astype(jnp.bfloat16), w_ref[...],
                preferred_element_type=jnp.float32) + b_ref[...]       # (bb, E)

    if normalize:
        sumsq = jnp.sum(y * y, axis=-1, keepdims=True)
        y = y * jax.lax.rsqrt(jnp.maximum(sumsq, 1e-24))

    o_ref[...] = y.astype(o_ref.dtype)


# ----------------------------------------------------------------------------
# Wrappers (pallas_call plumbing)
# ----------------------------------------------------------------------------
def image_encode_pallas(patches, w1, b1, w2, b2, *, normalize=True,
                        block_batch=None):
    """patches: [B, T, Kp] bf16 -> embeddings [B, E] f32 (one fused kernel)."""
    B, T, Kp = patches.shape
    Kp2, H = w1.shape
    H2, E = w2.shape
    assert Kp == Kp2 and H == H2
    assert Kp % 128 == 0 and H % 128 == 0 and E % 128 == 0, "lane-dense dims"
    assert T % 8 == 0, "patch count must be sublane aligned"

    bb = block_batch or _pick_block_batch(B, T)
    assert B % bb == 0, "block batch must divide B (full-extent blocks)"

    kern = functools.partial(_image_head_kernel, normalize=normalize)
    return pl.pallas_call(
        kern,
        out_shape=jax.ShapeDtypeStruct((B, E), jnp.float32),
        grid_spec=pltpu.PrefetchScalarGridSpec(
            num_scalar_prefetch=0,
            grid=(B // bb,),                 # >= 2 parallel steps -> both v7x TCs
            in_specs=[
                pl.BlockSpec((bb, T, Kp), lambda b: (b, 0, 0)),
                pl.BlockSpec((Kp, H), lambda b: (0, 0)),
                pl.BlockSpec((1, H), lambda b: (0, 0)),
                pl.BlockSpec((H, E), lambda b: (0, 0)),
                pl.BlockSpec((1, E), lambda b: (0, 0)),
            ],
            out_specs=pl.BlockSpec((bb, E), lambda b: (b, 0)),
        ),
        compiler_params=pltpu.CompilerParams(
            dimension_semantics=("parallel",),
            vmem_limit_bytes=_VMEM_LIMIT_BYTES),
    )(patches, w1, b1.reshape(1, H), w2, b2.reshape(1, E))


def text_encode_pallas(emb, pos, pool_w, w, b, *, normalize=True,
                       block_batch=None):
    """emb: [B, S, W] bf16 gathered token embeddings -> [B, E] f32."""
    B, S, W = emb.shape
    S2, W2 = pos.shape
    W3, E = w.shape
    assert S == S2 and W == W2 and W == W3
    assert pool_w.shape == (B, S)
    assert W % 128 == 0 and E % 128 == 0, "lane-dense dims"

    bb = block_batch or _pick_block_batch(B, 1)
    assert B % bb == 0, "block batch must divide B (full-extent blocks)"

    kern = functools.partial(_text_head_kernel, normalize=normalize)
    return pl.pallas_call(
        kern,
        out_shape=jax.ShapeDtypeStruct((B, E), jnp.float32),
        grid_spec=pltpu.PrefetchScalarGridSpec(
            num_scalar_prefetch=0,
            grid=(B // bb,),
            in_specs=[
                pl.BlockSpec((bb, S, W), lambda b: (b, 0, 0)),
                pl.BlockSpec((S, W), lambda b: (0, 0)),
                pl.BlockSpec((bb, S), lambda b: (b, 0)),
                pl.BlockSpec((W, E), lambda b: (0, 0)),
                pl.BlockSpec((1, E), lambda b: (0, 0)),
            ],
            out_specs=pl.BlockSpec((bb, E), lambda b: (b, 0)),
        ),
        compiler_params=pltpu.CompilerParams(
            dimension_semantics=("parallel",),
            vmem_limit_bytes=_VMEM_LIMIT_BYTES),
    )(emb, pos, pool_w, w, b.reshape(1, E))


# ----------------------------------------------------------------------------
# CLIP model (JAX glue + fused Pallas heads)
# ----------------------------------------------------------------------------
class CLIPPallas:
    def __init__(self, *, embed_dim=128, img_channels=3, img_size=32, patch=8,
                 img_hidden=128, vocab_size=32, seq_len=8, text_width=128,
                 output_dict=False, seed=0):
        self.embed_dim = embed_dim
        self.img_channels = img_channels
        self.img_size = img_size
        self.patch = patch
        self.img_hidden = img_hidden
        self.vocab_size = vocab_size
        self.seq_len = seq_len
        self.text_width = text_width
        self.output_dict = output_dict

        patch_dim = img_channels * patch * patch
        self.patch_dim = patch_dim
        self.k_pad = _round_up(patch_dim, 128)      # 192 -> 256 (lane-dense)

        key = jax.random.PRNGKey(seed)
        ks = jax.random.split(key, 8)
        init = lambda k, shape: 0.02 * jax.random.normal(k, shape, jnp.float32)

        # image encoder params (patchify conv as GEMM + projection head).
        # Weights pre-padded along K and pre-cast to bf16 (half the DMA bytes,
        # no in-kernel casts); biases stay f32.
        pw = init(ks[0], (patch_dim, img_hidden))
        pw = jnp.pad(pw, ((0, self.k_pad - patch_dim), (0, 0)))
        self.patch_w = pw.astype(jnp.bfloat16)                  # (Kp, H) bf16
        self.patch_b = init(ks[1], (img_hidden,))                # f32
        self.img_proj_w = init(ks[2], (img_hidden, embed_dim)).astype(jnp.bfloat16)
        self.img_proj_b = init(ks[3], (embed_dim,))               # f32

        # text encoder params (token + positional embed + projection head)
        self.tok_emb = init(ks[4], (vocab_size, text_width))      # f32 table
        self.pos_emb = init(ks[5], (seq_len, text_width))         # f32
        self.txt_proj_w = init(ks[6], (text_width, embed_dim)).astype(jnp.bfloat16)
        self.txt_proj_b = init(ks[7], (embed_dim,))               # f32

        # logit scale, same init as the PyTorch module
        self.logit_scale = jnp.asarray(math.log(1.0 / 0.07), jnp.float32)

    # --- logit scale (plain JAX — a (1,1) kernel is pure launch overhead) ---
    def _exponentiate_and_clip_logits(self, max_scale=100.0):
        # Reference: scale = logit_scale.exp(); scale = clamp(scale, 0, max)
        return jnp.clip(jnp.exp(self.logit_scale), 0.0, max_scale)

    # --- image path -----------------------------------------------------
    def encode_image(self, image, normalize=False):
        # image: [B, C, H, W]  (NCHW, matching PyTorch conv input)
        B, C, H, W = image.shape
        p = self.patch
        assert H % p == 0 and W % p == 0, "image size must be a multiple of patch"
        hn, wn = H // p, W // p
        # im2col glue (layout plumbing in plain JAX): -> [B, T, C*p*p]
        patches = image.reshape(B, C, hn, p, wn, p)
        patches = jnp.transpose(patches, (0, 2, 4, 1, 3, 5))
        patches = patches.reshape(B, hn * wn, C * p * p)
        # zero-pad K to a 128 multiple (matches the zero-padded patch_w rows)
        k_extra = self.k_pad - patches.shape[-1]
        if k_extra:
            patches = jnp.pad(patches, ((0, 0), (0, 0), (0, k_extra)))
        patches = patches.astype(jnp.bfloat16)   # halves HBM->VMEM DMA bytes
        # fused patch-GEMM + GELU + mean-pool + projection (+ normalize)
        return image_encode_pallas(patches, self.patch_w, self.patch_b,
                                   self.img_proj_w, self.img_proj_b,
                                   normalize=normalize)

    # --- text path ------------------------------------------------------
    def encode_text(self, text, normalize=False):
        # text: [B, S] int32 token ids
        # TODO(synk): at real vocab/width scale, fold this gather into the
        # kernel (scalar-prefetched token ids + pl.Element index_map or a
        # manual DMA gather from the table kept in HBM via memory_space=pl.ANY)
        # to avoid the HBM round trip of the gathered [B, S, W] array.
        emb = jnp.take(self.tok_emb, text, axis=0).astype(jnp.bfloat16)
        # EOT-style pooling: feature at the argmax-token position (CLIP text
        # towers pool the EOT token, which carries the largest id).
        # TODO(synk): TextTransformer attention blocks are not implemented
        # (internals unspecified by the reference module).
        pool_w = jax.nn.one_hot(jnp.argmax(text, axis=-1), text.shape[-1],
                                dtype=jnp.float32)
        return text_encode_pallas(emb, self.pos_emb, pool_w,
                                  self.txt_proj_w, self.txt_proj_b,
                                  normalize=normalize)

    # --- forward --------------------------------------------------------
    def __call__(self, image=None, text=None):
        image_embeddings = (self.encode_image(image, normalize=True)
                            if image is not None else None)
        text_embeddings = (self.encode_text(text, normalize=True)
                           if text is not None else None)
        scale = self._exponentiate_and_clip_logits()
        if self.output_dict:
            return {"image_features": image_embeddings,
                    "text_features": text_embeddings,
                    "logit_scale": scale}
        return image_embeddings, text_embeddings, scale


# ----------------------------------------------------------------------------
# main
# ----------------------------------------------------------------------------
if __name__ == "__main__":
    key = jax.random.PRNGKey(0)
    k_img, k_txt = jax.random.split(key)

    # B=16 with bb=8 -> 2 "parallel" grid steps (both v7x TensorCores busy),
    # GEMM1 M = 8*16 = 128 rows, projection GEMMs M = 8 rows per step.
    B = 16
    model = CLIPPallas(embed_dim=128, img_channels=3, img_size=32, patch=8,
                       img_hidden=128, vocab_size=32, seq_len=8,
                       text_width=128, seed=0)

    image = jax.random.normal(k_img, (B, 3, 32, 32), jnp.float32)   # NCHW
    text = jax.random.randint(k_txt, (B, 8), 0, 32, jnp.int32)

    img_emb, txt_emb, scale = model(image=image, text=text)
    jax.block_until_ready((img_emb, txt_emb, scale))

    assert img_emb.shape == (B, 128)
    assert txt_emb.shape == (B, 128)
    # L2 norms should be ~1 after normalize=True (normalization done in f32)
    assert jnp.allclose(jnp.linalg.norm(img_emb, axis=-1), 1.0, atol=1e-4)
    assert jnp.allclose(jnp.linalg.norm(txt_emb, axis=-1), 1.0, atol=1e-4)
    # logit scale = clamp(exp(log(1/0.07)), 0, 100) = 1/0.07
    assert jnp.allclose(scale, 1.0 / 0.07, rtol=1e-5)

    # normalize=False path is respected (returns raw pooled/projected features)
    raw = model.encode_image(image, normalize=False)
    jax.block_until_ready(raw)
    assert raw.shape == (B, 128)

    print("KERNEL_OK")
</pallas_src>

<mosaic_0001>
module attributes {stable_mosaic.version = 11 : i64} {
  func.func @_image_head_kernel(%arg0: i32, %arg1: memref<8x16x256xbf16, #tpu.memory_space<vmem>>, %arg2: memref<256x128xbf16, #tpu.memory_space<vmem>>, %arg3: memref<1x128xf32, #tpu.memory_space<vmem>>, %arg4: memref<128x128xbf16, #tpu.memory_space<vmem>>, %arg5: memref<1x128xf32, #tpu.memory_space<vmem>>, %arg6: memref<8x128xf32, #tpu.memory_space<vmem>>) attributes {dimension_semantics = [#tpu.dimension_semantics<parallel>], iteration_bounds = array<i64: 2>, scalar_prefetch = 0 : i64, scratch_operands = 0 : i64, tpu.core_type = #tpu.core_type<tc>, window_params = [{transform_indices = @transform_0, window_bounds = array<i64: 8, 16, 256>}, {pipeline_mode = #tpu.pipeline_mode<synchronous>, transform_indices = @transform_1, window_bounds = array<i64: 256, 128>}, {pipeline_mode = #tpu.pipeline_mode<synchronous>, transform_indices = @transform_2, window_bounds = array<i64: 1, 128>}, {pipeline_mode = #tpu.pipeline_mode<synchronous>, transform_indices = @transform_3, window_bounds = array<i64: 128, 128>}, {pipeline_mode = #tpu.pipeline_mode<synchronous>, transform_indices = @transform_4, window_bounds = array<i64: 1, 128>}, {transform_indices = @transform_5, window_bounds = array<i64: 8, 128>}]} {
    %c0 = arith.constant 0 : index
    %c0_0 = arith.constant 0 : index
    %c0_1 = arith.constant 0 : index
    %0 = vector.load %arg1[%c0, %c0_0, %c0_1] : memref<8x16x256xbf16, #tpu.memory_space<vmem>>, vector<8x16x256xbf16>
    %1 = vector.shape_cast %0 : vector<8x16x256xbf16> to vector<128x256xbf16>
    %c0_2 = arith.constant 0 : index
    %c0_3 = arith.constant 0 : index
    %2 = vector.load %arg2[%c0_2, %c0_3] : memref<256x128xbf16, #tpu.memory_space<vmem>>, vector<256x128xbf16>
    %cst = arith.constant dense<0.000000e+00> : vector<128x128xf32>
    %3 = tpu.matmul %1, %2, %cst {dimension_numbers = #tpu.dot_dimension_numbers<[1], [0], [0], [1], [0, 0, 1, 1], [], []>} : vector<128x256xbf16>, vector<256x128xbf16>, vector<128x128xf32> -> vector<128x128xf32>
    %c0_4 = arith.constant 0 : index
    %c0_5 = arith.constant 0 : index
    %4 = vector.load %arg3[%c0_4, %c0_5] : memref<1x128xf32, #tpu.memory_space<vmem>>, vector<1x128xf32>
    %5 = vector.broadcast %4 : vector<1x128xf32> to vector<128x128xf32>
    %6 = arith.addf %3, %5 : vector<128x128xf32>
    %7 = arith.mulf %6, %6 : vector<128x128xf32>
    %8 = arith.mulf %6, %7 : vector<128x128xf32>
    %cst_6 = arith.constant 4.471500e-02 : f32
    %9 = vector.broadcast %cst_6 : f32 to vector<128x128xf32>
    %10 = arith.mulf %9, %8 : vector<128x128xf32>
    %11 = arith.addf %6, %10 : vector<128x128xf32>
    %cst_7 = arith.constant 0.797884583 : f32
    %12 = vector.broadcast %cst_7 : f32 to vector<128x128xf32>
    %13 = arith.mulf %12, %11 : vector<128x128xf32>
    %14 = math.tanh %13 : vector<128x128xf32>
    %cst_8 = arith.constant 1.000000e+00 : f32
    %15 = vector.broadcast %cst_8 : f32 to vector<128x128xf32>
    %16 = arith.addf %15, %14 : vector<128x128xf32>
    %cst_9 = arith.constant 5.000000e-01 : f32
    %17 = vector.broadcast %cst_9 : f32 to vector<128x128xf32>
    %18 = arith.mulf %17, %16 : vector<128x128xf32>
    %19 = arith.mulf %6, %18 : vector<128x128xf32>
    %20 = vector.shape_cast %19 : vector<128x128xf32> to vector<8x16x128xf32>
    %cst_10 = arith.constant dense<0.000000e+00> : vector<8x128xf32>
    %21 = vector.multi_reduction <add>, %20, %cst_10 [1] : vector<8x16x128xf32> to vector<8x128xf32>
    %cst_11 = arith.constant 1.600000e+01 : f32
    %22 = vector.broadcast %cst_11 : f32 to vector<8x128xf32>
    %23 = arith.divf %21, %22 : vector<8x128xf32>
    %24 = arith.truncf %23 : vector<8x128xf32> to vector<8x128xbf16>
    %c0_12 = arith.constant 0 : index
    %c0_13 = arith.constant 0 : index
    %25 = vector.load %arg4[%c0_12, %c0_13] : memref<128x128xbf16, #tpu.memory_space<vmem>>, vector<128x128xbf16>
    %cst_14 = arith.constant dense<0.000000e+00> : vector<8x128xf32>
    %26 = tpu.matmul %24, %25, %cst_14 {dimension_numbers = #tpu.dot_dimension_numbers<[1], [0], [0], [1], [0, 0, 1, 1], [], []>} : vector<8x128xbf16>, vector<128x128xbf16>, vector<8x128xf32> -> vector<8x128xf32>
    %c0_15 = arith.constant 0 : index
    %c0_16 = arith.constant 0 : index
    %27 = vector.load %arg5[%c0_15, %c0_16] : memref<1x128xf32, #tpu.memory_space<vmem>>, vector<1x128xf32>
    %28 = vector.broadcast %27 : vector<1x128xf32> to vector<8x128xf32>
    %29 = arith.addf %26, %28 : vector<8x128xf32>
    %30 = arith.mulf %29, %29 : vector<8x128xf32>
    %cst_17 = arith.constant dense<0.000000e+00> : vector<8xf32>
    %31 = vector.multi_reduction <add>, %30, %cst_17 [1] : vector<8x128xf32> to vector<8xf32>
    %32 = vector.shape_cast %31 : vector<8xf32> to vector<8x1xf32>
    %cst_18 = arith.constant 1.000000e-24 : f32
    %33 = vector.broadcast %cst_18 : f32 to vector<8x1xf32>
    %34 = arith.maximumf %32, %33 : vector<8x1xf32>
    %35 = math.rsqrt %34 : vector<8x1xf32>
    %36 = vector.broadcast %35 : vector<8x1xf32> to vector<8x128xf32>
    %37 = arith.mulf %29, %36 : vector<8x128xf32>
    %c0_19 = arith.constant 0 : index
    %c0_20 = arith.constant 0 : index
    %38 = vector.load %arg6[%c0_19, %c0_20] : memref<8x128xf32, #tpu.memory_space<vmem>>, vector<8x128xf32>
    tpu.vector_store %arg6[%c0_19, %c0_20], %37 {strides = array<i32>} : memref<8x128xf32, #tpu.memory_space<vmem>>, vector<8x128xf32>,
    return
  }
  func.func @transform_0(%arg0: i32) -> (i32, i32, i32) {
    %c0_i32 = arith.constant 0 : i32
    %c0_i32_0 = arith.constant 0 : i32
    %c0_i32_1 = arith.constant 0 : i32
    return %arg0, %c0_i32, %c0_i32_0 : i32, i32, i32
  }
  func.func @transform_1(%arg0: i32) -> (i32, i32) {
    %c0_i32 = arith.constant 0 : i32
    %c0_i32_0 = arith.constant 0 : i32
    %c0_i32_1 = arith.constant 0 : i32
    return %c0_i32, %c0_i32_0 : i32, i32
  }
  func.func @transform_2(%arg0: i32) -> (i32, i32) {
    %c0_i32 = arith.constant 0 : i32
    %c0_i32_0 = arith.constant 0 : i32
    %c0_i32_1 = arith.constant 0 : i32
    return %c0_i32, %c0_i32_0 : i32, i32
  }
  func.func @transform_3(%arg0: i32) -> (i32, i32) {
    %c0_i32 = arith.constant 0 : i32
    %c0_i32_0 = arith.constant 0 : i32
    %c0_i32_1 = arith.constant 0 : i32
    return %c0_i32, %c0_i32_0 : i32, i32
  }
  func.func @transform_4(%arg0: i32) -> (i32, i32) {
    %c0_i32 = arith.constant 0 : i32
    %c0_i32_0 = arith.constant 0 : i32
    %c0_i32_1 = arith.constant 0 : i32
    return %c0_i32, %c0_i32_0 : i32, i32
  }
  func.func @transform_5(%arg0: i32) -> (i32, i32) {
    %c0_i32 = arith.constant 0 : i32
    %c0_i32_0 = arith.constant 0 : i32
    return %arg0, %c0_i32 : i32, i32
  }
}

</mosaic_0001>

<bundles_post_ra>
// kernel: tpu_custom_call.1
= control target key start
LH: loop header
LB: loop body
LE: loop exit
PB: predicated region body
PF: predicated region fallthrough
CT: control target
= control target key end

     0   :  { %10 = vsyncpa [#allocation3], 0  ;;  %s1920_s0 = inlined_call_operand.hbm [shape: bf16[16,16,256], index: 0, kind: input, shape index: {}]   ;;  %s1921_s1 = inlined_call_operand.hbm [shape: bf16[256,128], index: 1, kind: input, shape index: {}]   ;;  %s1922_s2 = inlined_call_operand.vmem [shape: f32[1,128], index: 2, kind: input, shape index: {}]   ;;  %s1923_s3 = inlined_call_operand.hbm [shape: bf16[128,128], index: 3, kind: input, shape index: {}]   ;;  %s1924_s4 = inlined_call_operand.vmem [shape: f32[1,128], index: 4, kind: input, shape index: {}]   ;;  %s1925_s5 = inlined_call_operand.hbm [shape: f32[16,128], index: 5, kind: output, shape index: {}]  }
   0x1   :  { %12 = vsyncpa [#allocation3 + $0x1], 0 }
   0x2   :  { %13 = vsyncpa [#allocation6], 0 }
   0x3   :  { %14 = vsyncpa [#allocation4], 0 }
   0x4   :  { %16 = vsyncpa [#allocation4 + $0x1], 0  ;;  %s1608_s18 = smov 0   ;;  %s1610_s19 = smov 0  }
   0x5   :  { %s1612_s20 = smov 0   ;;  %s1614_s21 = smov 0  }
   0x6 LB: > { %s1629_s22 = sadd.s32 4294967295, %s1569_s21   ;;  %s1063_s23 = sadd.s32 4294967294, %s1569_s21   ;;  %s1569_s21 = sphi %s1614_s21, %s1935_s21   ;;  %s1565_s20 = sphi %s1612_s20, %s1934_s20   ;;  %s1561_s19 = sphi %s1610_s19, %s1933_s19   ;;  %s1557_s18 = sphi %s1608_s18, %s1932_s18  }
   0x7   : > { %p42_p0 = scmp.ne.s32.totalorder %s1561_s19, %s1557_s18  ;;  %p43_p1 = scmp.eq.s32.totalorder %s1629_s22, 0 }
   0x8   : > { %p150_p2 = scmp.eq.s32.totalorder %s1629_s22, 1  ;;  %p156_p3 = scmp.eq.s32.totalorder %s1063_s23, 1 }
   0x9   : > { %p1638_p4 = por %p43_p1, %p42_p0  ;;  %p1064_p5 = scmp.ge.s32.totalorder %s1569_s21, 1 }
   0xa   : > { %p1643_p6 = por %p156_p3, %p42_p0  ;;  %p163_p7 = scmp.lt.s32.totalorder %s1569_s21, 3 }
   0xb   : > { %s174_s28 = sshll.u32 %s1921_s1, 4  ;;  %s1571_s30 = smov [#allocation5]   ;;  %s175_s28 = int_to_ptr.hbm [resolvable:$true] %s174_s28 }
   0xc   : > { %p1651_p8 = pnand %p1064_p5, %p163_p7  ;;  %s176_s6 = sshll.u32 %s1571_s30, 4  ;;  %s177_s6 = int_to_ptr.vmem [resolvable:$true] %s176_s6 }
   0xd   : > { %s191_s9 = sshll.u32 %s1923_s3, 4  ;;  %s1572_s10 = smov 64   ;;  %s192_s9 = int_to_ptr.hbm [resolvable:$true] %s191_s9 }
   0xe   : > { %p1311_p9 = pneg %p1651_p8  ;;  %s1573_s11 = smov 4  }
   0xf   : > { %s1574_s12 = smov [#allocation7]   ;;  %s1664_s14 = sadd.s32 1, %s1569_s21  }
  0x10   : > { %p1312_p10 = pnand %p1311_p9, %p43_p1  ;;  %s193_s13 = sshll.u32 %s1574_s12, 4  ;;  %s194_s13 = int_to_ptr.vmem [resolvable:$true] %s193_s13 }
  0x11   : > { %s29_s15 = sadd.s32 1, %s1565_s20  ;;  %s26_s16 = ssub.s32 %s1569_s21, %s1664_s14 }
  0x12   : > { %1314 = dma.hbm_to_vmem [thread:$0]  (!%p1312_p10), %s175_s28, 2048, %s177_s6, [#allocation6], %s1572_s10, %s1572_s10, %s1573_s11  }
  0x13   : > { %1317 = dma.hbm_to_vmem [thread:$0]  (!%p1312_p10), %s192_s9, 1024, %s194_s13, [#allocation6], %s1572_s10, %s1572_s10, %s1573_s11  }
  0x14   : > { %p36_p12 = scmp.ne.s32.totalorder %s1565_s20, %s1561_s19  ;;  %p27_p13 = scmp.eq.s32.totalorder %s26_s16, 0 }
  0x15   : > { %p37_p0 = scmp.eq.s32.totalorder %s1569_s21, 0  ;;  %p1328_p5 = scmp.lt.s32.totalorder %s1569_s21, 2 }
  0x16   : > { %p1674_p3 = por %p150_p2, %p36_p12  ;;  %s210_s26 = sand.u32 1, %s1565_s20  }
  0x17   : > { %s1680_s23 = scalar_select %p27_p13, %s1565_s20, %s29_s15  }
  0x18   : > { %p38_p7 = por %p37_p0, %p36_p12  ;;  %s1068_s27 = sshll.u32 %s210_s26, 7 }
  0x19   : > { %s1242_s28 = sshll.u32 %s1569_s21, 7  ;;  %s214_s8 = scalar_lea.vmem [#allocation2], %s1068_s27 }
  0x1a   : > { %s220_s7 = scalar_lea.hbm %s1920_s0, %s1242_s28  ;;  %s223_s9 = sshll.u32 %s214_s8, 4  ;;  %s224_s9 = int_to_ptr.vmem [resolvable:$true] %s223_s9 }
  0x1b   : > { %s221_s10 = sshll.u32 %s220_s7, 4  ;;  %p1687_p2 = pnand %p1328_p5, %p38_p7  ;;  %s222_s10 = int_to_ptr.hbm [resolvable:$true] %s221_s10 }
  0x1c   : > { %s211_s12 = scalar_lea.sflag [#allocation3], %s210_s26  ;;  %s1469_s13 = sshra.s32 %s222_s10, 4  ;;  %s1470_s13 = int_to_ptr.hbm [resolvable:$true] %s1469_s13 }
  0x1d   : > { %s1471_s15 = scalar_lea.hbm %s1470_s13, 128  ;;  %p1473_p10 = pneg %p1687_p2 }
  0x1e   : > { %p1472_p9 = scmp.ne.s32.totalorder %s1470_s13, %s1471_s15  ;;  %s1476_s28 = scalar_lea.hbm %s1920_s0, 256 }
  0x1f   : > { %p1477_p0 = scmp.lt.s32.totalorder %s1470_s13, %s1920_s0  ;;  %p1478_p5 = scmp.lt.s32.totalorder %s1476_s28, %s1471_s15 }
  0x20   : > { %p1474_p12 = pnand %p1473_p10, %p1472_p9 }
  0x21   : > { %p1479_p7 = por %p1478_p5, %p1477_p0 }
  0x22   : > { %p1475_p13 = pneg %p1474_p12 }
  0x24   : > { %p1480_p11 = pnand %p1479_p7, %p1475_p13 }
  0x26   : > { %1483 = shalt.err (!%p1480_p11)
}
  0x27   : > { %s1575_s26 = smov 128   ;;  %s1576_s7 = smov 8  }
  0x28   : > { %1321 = dma.hbm_to_vmem [thread:$0]  (!%p1687_p2), %s222_s10, 2048, %s224_s9, %s211_s12, %s1575_s26, %s1575_s26, %s1576_s7  }
  0x29   : > { %235 = sbr.rel (%p1651_p8) target bundleno = 609 (0x261), region = 40  ;;  %s1704_s8 = sand.u32 (!%p1651_p8), 1, %s1561_s19  }
  0x2a   : > { %s1073_s16 = sshll.u32 (!%p1651_p8), %s1704_s8, 7  ;;  %s238_s13 = scalar_lea.sflag (!%p1651_p8), [#allocation3], %s1704_s8 }
  0x2b   : > { %s1708_s15 = scalar_lea.vmem (!%p1651_p8), [#allocation2], %s1073_s16 }
  0x2e   : > { %1544 = dma.done.wait (%p1638_p4), %s238_s13, 2048  }
  0x2f   : > { %1546 = vsyncadd (%p1638_p4), %s238_s13, 4294965248 }
  0x30   : > { %1548 = dma.done.wait (%p43_p1), [#allocation6], 3072  }
  0x31   : > { %1550 = vsyncadd (%p43_p1), [#allocation6], 4294964224  ;;  %v1266_v0 = vld [vmem:[#allocation5 + $0x38] sm:$0xff]  ;;  %v1265_v2 = vld [vmem:[#allocation5 + $0x30] sm:$0xff]  ;;  %vm865_vm1 = vcmask 1041409   ;;  %vm867_vm2 = vcmask 1042434  }
  0x32   : > { %v1274_v1 = vld [vmem:[#allocation5 + $0x78] sm:$0xff]  ;;  %508 = vmatpush.bf16.msra.mxu0 %v1266_v0  ;;  %1283 = vmatpush.bf16.msra.mxu3 %v1266_v0  ;;  %v1273_v3 = vld [vmem:[#allocation5 + $0x70] sm:$0xff]  ;;  %v1264_v4 = vld [vmem:[#allocation5 + $0x28] sm:$0xff]  ;;  %vm869_vm3 = vcmask 1043459   ;;  %vm871_vm4 = vcmask 1044484   ;;  %vm873_vm5 = vcmask 1045509  }
  0x33   : > { %557 = vmatpush.bf16.msra.mxu1 %v1274_v1  ;;  %1291 = vmatpush.bf16.msra.mxu2 %v1274_v1  ;;  %v1272_v5 = vld [vmem:[#allocation5 + $0x68] sm:$0xff]  ;;  %v1263_v6 = vld [vmem:[#allocation5 + $0x20] sm:$0xff]  ;;  %v1262_v8 = vld [vmem:[#allocation5 + $0x18] sm:$0xff]  ;;  %vm875_vm6 = vcmask 1046534   ;;  %vm877_vm7 = vcmask 1047559   ;;  %s1076_s11 = sshll.u32 %s1704_s8, 3 }
  0x34   : > { %v1271_v7 = vld [vmem:[#allocation5 + $0x60] sm:$0xff]  ;;  %v1270_v9 = vld [vmem:[#allocation5 + $0x58] sm:$0xff]  ;;  %v1261_v10 = vld [vmem:[#allocation5 + $0x10] sm:$0xff]  ;;  %s1238_s12 = sshll.u32 %s1629_s22, 3  ;;  %s278_s6 = scalar_lea.vmem [#allocation8], %s1076_s11 }
  0x35   : > { %v1269_v11 = vld [vmem:[#allocation5 + $0x50] sm:$0xff]  ;;  %v1260_v12 = vld [vmem:[#allocation5 + $0x8] sm:$0xff]  ;;  %v1259_v14 = vld [vmem:[#allocation5] sm:$0xff]  ;;  %s969_s30 = scalar_lea.hbm %s1925_s5, %s1238_s12  ;;  %s971_s26 = sshll.u32 %s278_s6, 4  ;;  %s972_s26 = int_to_ptr.vmem [resolvable:$true] %s971_s26 }
  0x36   : > { %509 = vmatpush.bf16.msra.mxu0 %v1265_v2  ;;  %1284 = vmatpush.bf16.msra.mxu3 %v1265_v2  ;;  %v1268_v13 = vld [vmem:[#allocation5 + $0x48] sm:$0xff]  ;;  %v1267_v15 = vld [vmem:[#allocation5 + $0x40] sm:$0xff]  ;;  %v1119_v18 = vld [vmem:[%s1708_s15 + $0x50] sm:$0xf]  ;;  %s973_s7 = sshll.u32 %s969_s30, 4  ;;  %s959_s22 = scalar_lea.sflag [#allocation4], %s1704_s8  ;;  %s974_s7 = int_to_ptr.hbm [resolvable:$true] %s973_s7 }
  0x37   : > { %558 = vmatpush.bf16.msra.mxu1 %v1273_v3  ;;  %1292 = vmatpush.bf16.msra.mxu2 %v1273_v3  ;;  %v1079_v16 = vld [vmem:[%s1708_s15] sm:$0xf]  ;;  %v1244_v17 = vld [vmem:[%s1708_s15 + $0x4] sm:$0xf0]  ;;  %v1254_v19 = vld [vmem:[%s1708_s15 + $0x54] sm:$0xf0] }
  0x38   : > { %v1243_v20 = vld [vmem:[%s1708_s15 + $0x4] sm:$0xf]  ;;  %v1081_v21 = vld [vmem:[%s1708_s15 + $0x8] sm:$0xf0]  ;;  %v1253_v22 = vld [vmem:[%s1708_s15 + $0x54] sm:$0xf]  ;;  %v1080_v24 = vor.u32 %v1244_v17, %v1079_v16  ;;  %v1120_v25 = vor.u32 %v1254_v19, %v1119_v18 }
  0x39   : > { %v1121_v23 = vld [vmem:[%s1708_s15 + $0x58] sm:$0xf0]  ;;  %v1084_v26 = vor.u32 %v1243_v20, %v1081_v21  ;;  %v1087_v28 = vld [vmem:[%s1708_s15 + $0x10] sm:$0xf]  ;;  %v1246_v29 = vld [vmem:[%s1708_s15 + $0x14] sm:$0xf0] }
  0x3a   : > { %510 = vmatpush.bf16.msra.mxu0 %v1264_v4  ;;  %1285 = vmatpush.bf16.msra.mxu3 %v1264_v4  ;;  %v1124_v27 = vor.u32 %v1253_v22, %v1121_v23  ;;  %v1127_v30 = vld [vmem:[%s1708_s15 + $0x60] sm:$0xf]  ;;  %v1256_v31 = vld [vmem:[%s1708_s15 + $0x64] sm:$0xf0]  ;;  %v1245_v32 = vld [vmem:[%s1708_s15 + $0x14] sm:$0xf]  ;;  %v1088_v36 = vor.u32 %v1246_v29, %v1087_v28 }
  0x3b   : > { %559 = vmatpush.bf16.msra.mxu1 %v1272_v5  ;;  %1293 = vmatpush.bf16.msra.mxu2 %v1272_v5  ;;  %v1089_v33 = vld [vmem:[%s1708_s15 + $0x18] sm:$0xf0]  ;;  %v1255_v34 = vld [vmem:[%s1708_s15 + $0x64] sm:$0xf]  ;;  %v1129_v35 = vld [vmem:[%s1708_s15 + $0x68] sm:$0xf0]  ;;  %v1128_v37 = vor.u32 %v1256_v31, %v1127_v30 }
  0x3c   : > { %v1092_v38 = vor.u32 %v1245_v32, %v1089_v33  ;;  %v1132_v39 = vor.u32 %v1255_v34, %v1129_v35  ;;  %v1095_v40 = vld [vmem:[%s1708_s15 + $0x20] sm:$0xf]  ;;  %v1248_v41 = vld [vmem:[%s1708_s15 + $0x24] sm:$0xf0]  ;;  %v1135_v42 = vld [vmem:[%s1708_s15 + $0x70] sm:$0xf] }
  0x3d   : > { %v1258_v43 = vld [vmem:[%s1708_s15 + $0x74] sm:$0xf0]  ;;  %v1247_v44 = vld [vmem:[%s1708_s15 + $0x24] sm:$0xf]  ;;  %v1097_v45 = vld [vmem:[%s1708_s15 + $0x28] sm:$0xf0]  ;;  %v1096_v48 = vor.u32 %v1248_v41, %v1095_v40 }
  0x3e   : > { %511 = vmatpush.bf16.msra.mxu0 %v1263_v6  ;;  %1286 = vmatpush.bf16.msra.mxu3 %v1263_v6  ;;  %v1257_v46 = vld [vmem:[%s1708_s15 + $0x74] sm:$0xf]  ;;  %v1137_v47 = vld [vmem:[%s1708_s15 + $0x78] sm:$0xf0]  ;;  %v1136_v49 = vor.u32 %v1258_v43, %v1135_v42  ;;  %v1100_v50 = vor.u32 %v1247_v44, %v1097_v45  ;;  %v1103_v52 = vld [vmem:[%s1708_s15 + $0x30] sm:$0xf] }
  0x3f   : > { %560 = vmatpush.bf16.msra.mxu1 %v1271_v7  ;;  %1294 = vmatpush.bf16.msra.mxu2 %v1271_v7  ;;  %v1140_v51 = vor.u32 %v1257_v46, %v1137_v47  ;;  %v1250_v53 = vld [vmem:[%s1708_s15 + $0x34] sm:$0xf0]  ;;  %v1249_v54 = vld [vmem:[%s1708_s15 + $0x34] sm:$0xf]  ;;  %v1105_v55 = vld [vmem:[%s1708_s15 + $0x38] sm:$0xf0] }
  0x40   : > { %v1104_v56 = vor.u32 %v1250_v53, %v1103_v52  ;;  %v1108_v57 = vor.u32 %v1249_v54, %v1105_v55  ;;  %v1111_v58 = vld [vmem:[%s1708_s15 + $0x40] sm:$0xf]  ;;  %v1252_v59 = vld [vmem:[%s1708_s15 + $0x44] sm:$0xf0]  ;;  %v1251_v60 = vld [vmem:[%s1708_s15 + $0x44] sm:$0xf] }
  0x41   : > { %v1113_v61 = vld [vmem:[%s1708_s15 + $0x48] sm:$0xf0]  ;;  %v1112_v62 = vor.u32 %v1252_v59, %v1111_v58  ;;  %v1753_v0 = vld [vmem:[%s1922_s2] ss:$0 sm:$0xff]  ;;  %s1513_s16 = sshra.s32 %s974_s7, 4  ;;  %s1519_s29 = scalar_lea.hbm %s1925_s5, 16  ;;  %s1514_s16 = int_to_ptr.hbm [resolvable:$true] %s1513_s16 }
  0x42   : > { %512 = vmatpush.bf16.msra.mxu0 %v1262_v8  ;;  %1287 = vmatpush.bf16.msra.mxu3 %v1262_v8  ;;  %v1116_v63 = vor.u32 %v1251_v60, %v1113_v61  ;;  %s1515_s13 = scalar_lea.hbm %s1514_s16, 8  ;;  %p1520_p11 = scmp.lt.s32.totalorder %s1514_s16, %s1925_s5 }
  0x43   : > { %561 = vmatpush.bf16.msra.mxu1 %v1270_v9  ;;  %1295 = vmatpush.bf16.msra.mxu2 %v1270_v9  ;;  %p1516_p1 = scmp.ne.s32.totalorder %s1514_s16, %s1515_s13  ;;  %p1521_p2 = scmp.lt.s32.totalorder %s1519_s29, %s1515_s13 }
  0x45   : > { %p1517_p4 = pnand %p1516_p1, %p1674_p3  ;;  %p1522_p9 = por %p1521_p2, %p1520_p11 }
  0x46   : > { %513 = vmatpush.bf16.msra.mxu0 %v1261_v10  ;;  %1288 = vmatpush.bf16.msra.mxu3 %v1261_v10 }
  0x47   : > { %562 = vmatpush.bf16.msra.mxu1 %v1269_v11  ;;  %1296 = vmatpush.bf16.msra.mxu2 %v1269_v11  ;;  %p1518_p8 = pneg %p1517_p4 }
  0x49   : > { %p1523_p10 = pnand %p1522_p9, %p1518_p8 }
  0x4a   : > { %514 = vmatpush.bf16.msra.mxu0 %v1260_v12  ;;  %1289 = vmatpush.bf16.msra.mxu3 %v1260_v12 }
  0x4b   : > { %563 = vmatpush.bf16.msra.mxu1 %v1268_v13  ;;  %1297 = vmatpush.bf16.msra.mxu2 %v1268_v13 }
  0x4e   : > { %515 = vmatpush.bf16.msra.mxu0 %v1259_v14  ;;  %1290 = vmatpush.bf16.msra.mxu3 %v1259_v14 }
  0x4f   : > { %564 = vmatpush.bf16.msra.mxu1 %v1267_v15  ;;  %1298 = vmatpush.bf16.msra.mxu2 %v1267_v15 }
  0x51   : > { %516 = vmatmul.bf16.vlgmr.msra.gmra.mxu0 %v1080_v24  ;;  %541 = vmatmul.bf16.vlgmr.msra.gmra.mxu3 %v1120_v25 }
  0x52   : > { %565 = vmatmul.bf16.vlgmr.msra.gmra.mxu1 %v1084_v26  ;;  %590 = vmatmul.bf16.vlgmr.msra.gmra.mxu2 %v1124_v27 }
  0x61   : > { %521 = vmatmul.bf16.gmra.mxu0 %v1088_v36  ;;  %546 = vmatmul.bf16.gmra.mxu3 %v1128_v37 }
  0x62   : > { %570 = vmatmul.bf16.gmra.mxu1 %v1092_v38  ;;  %595 = vmatmul.bf16.gmra.mxu2 %v1132_v39 }
  0x71   : > { %526 = vmatmul.bf16.gmra.mxu0 %v1096_v48  ;;  %551 = vmatmul.bf16.gmra.mxu3 %v1136_v49 }
  0x72   : > { %575 = vmatmul.bf16.gmra.mxu1 %v1100_v50  ;;  %600 = vmatmul.bf16.gmra.mxu2 %v1140_v51 }
  0x81   : > { %531 = vmatmul.bf16.gmra.mxu0 %v1104_v56 }
  0x82   : > { %580 = vmatmul.bf16.gmra.mxu1 %v1108_v57 }
  0x91   : > { %536 = vmatmul.bf16.gmra.mxu0 %v1112_v62 }
  0x92   : > { %585 = vmatmul.bf16.gmra.mxu1 %v1116_v63 }
  0xce   : > { %v517_v1 = vpop.f32.mrf.mxu0 }
  0xcf   : > { %v518_v2 = vadd.f32 %v1753_v0, %v517_v1  ;;  %v566_v3 = vpop.f32.mrf.mxu1 }
  0xd1   : > { %v1756_v4 = vadd.f32 %v566_v3, %v518_v2 }
  0xd3   : > { %v606_v25 = vmul.f32 %v1756_v4, %v1756_v4 }
  0xd4   : > { %v542_v5 = vpop.f32.mrf.mxu3 }
  0xd5   : > { %v591_v6 = vpop.f32.mrf.mxu2  ;;  %v543_v16 = vadd.f32 %v1753_v0, %v542_v5  ;;  %v622_v37 = vmul.f32 %v606_v25, %v1756_v4 }
  0xd6   : > { %v519_v7 = vpop.f32.mrf.mxu0 }
  0xd7   : > { %v568_v8 = vpop.f32.mrf.mxu1  ;;  %v1761_v20 = vadd.f32 %v591_v6, %v543_v16  ;;  %v520_v21 = vadd.f32 %v1753_v0, %v519_v7  ;;  %v638_v49 = vmul.f32 0.044715, %v622_v37 }
  0xd9   : > { %v616_v30 = vmul.f32 %v1761_v20, %v1761_v20  ;;  %v1775_v33 = vadd.f32 %v568_v8, %v520_v21  ;;  %v654_v1 = vadd.f32 %v638_v49, %v1756_v4 }
  0xdb   : > { %v632_v41 = vmul.f32 %v616_v30, %v1761_v20  ;;  %v607_v42 = vmul.f32 %v1775_v33, %v1775_v33 }
  0xdc   : > { %v544_v9 = vpop.f32.mrf.mxu3 }
  0xdd   : > { %v593_v10 = vpop.f32.mrf.mxu2  ;;  %v545_v26 = vadd.f32 %v1753_v0, %v544_v9  ;;  %v648_v54 = vmul.f32 0.044715, %v632_v41  ;;  %v623_v58 = vmul.f32 %v607_v42, %v1775_v33 }
  0xde   : > { %v522_v11 = vpop.f32.mrf.mxu0 }
  0xdf   : > { %v571_v12 = vpop.f32.mrf.mxu1  ;;  %v523_v19 = vadd.f32 %v1753_v0, %v522_v11  ;;  %v1785_v39 = vadd.f32 %v593_v10, %v545_v26  ;;  %v664_v6 = vadd.f32 %v648_v54, %v1761_v20  ;;  %v639_v8 = vmul.f32 0.044715, %v623_v58 }
  0xe1   : > { %v1769_v27 = vadd.f32 %v571_v12, %v523_v19  ;;  %v617_v51 = vmul.f32 %v1785_v39, %v1785_v39  ;;  %v655_v30 = vadd.f32 %v639_v8, %v1775_v33 }
  0xe3   : > { %v608_v38 = vmul.f32 %v1769_v27, %v1769_v27  ;;  %v633_v3 = vmul.f32 %v617_v51, %v1785_v39  ;;  %v671_v49 = vmul.f32 0.7978846, %v655_v30 }
  0xe4   : > { %v547_v13 = vpop.f32.mrf.mxu3 }
  0xe5   : > { %v596_v14 = vpop.f32.mrf.mxu2  ;;  %v548_v28 = vadd.f32 %v1753_v0, %v547_v13  ;;  %v624_v50 = vmul.f32 %v608_v38, %v1769_v27  ;;  %v649_v19 = vmul.f32 0.044715, %v633_v3 }
  0xe6   : > { %v524_v15 = vpop.f32.mrf.mxu0 }
  0xe7   : > { %v573_v17 = vpop.f32.mrf.mxu1  ;;  %v525_v18 = vadd.f32 %v1753_v0, %v524_v15  ;;  %v1787_v40 = vadd.f32 %v596_v14, %v548_v28  ;;  %v640_v2 = vmul.f32 0.044715, %v624_v50 }
  0xe9   : > { %v1764_v22 = vadd.f32 %v573_v17, %v525_v18  ;;  %v618_v52 = vmul.f32 %v1787_v40, %v1787_v40  ;;  %v670_v17 = vmul.f32 0.7978846, %v654_v1  ;;  %v656_v18 = vadd.f32 %v640_v2, %v1769_v27 }
  0xeb   : > { %v609_v34 = vmul.f32 %v1764_v22, %v1764_v22  ;;  %v634_v5 = vmul.f32 %v618_v52, %v1787_v40  ;;  %1373 = vtanh.f32 %v670_v17  ;;  %v672_v42 = vmul.f32 0.7978846, %v656_v18 }
  0xec   : > { %v549_v23 = vpop.f32.mrf.mxu3 }
  0xed   : > { %v598_v24 = vpop.f32.mrf.mxu2  ;;  %v550_v35 = vadd.f32 %v1753_v0, %v549_v23  ;;  %v625_v43 = vmul.f32 %v609_v34, %v1764_v22  ;;  %v650_v21 = vmul.f32 0.044715, %v634_v5 }
  0xee   : > { %v527_v29 = vpop.f32.mrf.mxu0 }
  0xef   : > { %v528_v31 = vadd.f32 %v1753_v0, %v527_v29  ;;  %v576_v32 = vpop.f32.mrf.mxu1  ;;  %v1795_v45 = vadd.f32 %v598_v24, %v550_v35  ;;  %v641_v59 = vmul.f32 0.044715, %v625_v43  ;;  %v680_v24 = vmul.f32 0.7978846, %v664_v6 }
  0xf0   : > { %v665_v43 = vadd.f32 %v649_v19, %v1785_v39 }
  0xf1   : > { %v1780_v36 = vadd.f32 %v576_v32, %v528_v31  ;;  %v619_v61 = vmul.f32 %v1795_v45, %v1795_v45  ;;  %v657_v9 = vadd.f32 %v641_v59, %v1764_v22  ;;  %1375 = vtanh.f32 %v680_v24  ;;  %v1374_v1 = vpop.eup %1373 }
  0xf3   : > { %v610_v44 = vmul.f32 %v1780_v36, %v1780_v36  ;;  %v635_v11 = vmul.f32 %v619_v61, %v1795_v45  ;;  %v673_v31 = vmul.f32 0.7978846, %v657_v9 }
  0xf4   : > { %v552_v46 = vpop.f32.mrf.mxu3 }
  0xf5   : > { %v553_v47 = vadd.f32 %v1753_v0, %v552_v46  ;;  %v601_v48 = vpop.f32.mrf.mxu2  ;;  %v626_v60 = vmul.f32 %v610_v44, %v1780_v36  ;;  %v651_v34 = vmul.f32 0.044715, %v635_v11  ;;  %v666_v44 = vadd.f32 %v650_v21, %v1787_v40 }
  0xf6   : > { %v529_v53 = vpop.f32.mrf.mxu0  ;;  %1377 = vtanh.f32 %v673_v31 }
  0xf7   : > { %v530_v55 = vadd.f32 %v1753_v0, %v529_v53  ;;  %v578_v56 = vpop.f32.mrf.mxu1  ;;  %v1804_v57 = vadd.f32 %v601_v48, %v553_v47  ;;  %v642_v10 = vmul.f32 0.044715, %v626_v60  ;;  %v667_v50 = vadd.f32 %v651_v34, %v1795_v45  ;;  %v1376_v3 = vpop.eup %1375 }
  0xf8   : > { %1379 = vtanh.f32 %v672_v42 }
  0xf9   : > { %v1810_v62 = vadd.f32 %v578_v56, %v530_v55  ;;  %v620_v63 = vmul.f32 %v1804_v57, %v1804_v57  ;;  %v658_v32 = vadd.f32 %v642_v10, %v1780_v36  ;;  %v681_v55 = vmul.f32 0.7978846, %v665_v43 }
  0xfa   : > { %v682_v56 = vmul.f32 0.7978846, %v666_v44  ;;  %v683_v2 = vmul.f32 0.7978846, %v667_v50 }
  0xfb   : > { %v611_v7 = vmul.f32 %v1810_v62, %v1810_v62  ;;  %v636_v14 = vmul.f32 %v620_v63, %v1804_v57  ;;  %v674_v51 = vmul.f32 0.7978846, %v658_v32  ;;  %v1281_v32 = vld [vmem:[#allocation7 + $0x30] sm:$0xff] }
  0xfc   : > { %v554_v12 = vpop.f32.mrf.mxu3  ;;  %v1378_v8 = vpop.eup %1377 }
  0xfd   : > { %v627_v13 = vmul.f32 %v611_v7, %v1810_v62  ;;  %v555_v15 = vadd.f32 %v1753_v0, %v554_v12  ;;  %v603_v16 = vpop.f32.mrf.mxu2  ;;  %v652_v37 = vmul.f32 0.044715, %v636_v14  ;;  %v1282_v14 = vld [vmem:[#allocation7 + $0x38] sm:$0xff]  ;;  %v705_v18 = vadd.f32 1.0, %v1378_v8 }
  0xfe   : > { %v532_v23 = vpop.f32.mrf.mxu0  ;;  %v1380_v12 = vpop.eup %1379  ;;  %929 = vmatpush.bf16.msrb.mxu2 %v1282_v14 }
  0xff   : > { %v643_v25 = vmul.f32 0.044715, %v627_v13  ;;  %v533_v26 = vadd.f32 %v1753_v0, %v532_v23  ;;  %v581_v28 = vpop.f32.mrf.mxu1  ;;  %v1827_v29 = vadd.f32 %v603_v16, %v555_v15  ;;  %v668_v52 = vadd.f32 %v652_v37, %v1804_v57 }
 0x100   : > { %v702_v13 = vadd.f32 1.0, %v1374_v1  ;;  %v704_v30 = vadd.f32 1.0, %v1380_v12  ;;  %v721_v43 = vmul.f32 0.5, %v705_v18 }
 0x101   : > { %v659_v35 = vadd.f32 %v643_v25, %v1810_v62  ;;  %v1832_v38 = vadd.f32 %v581_v28, %v533_v26  ;;  %v621_v41 = vmul.f32 %v1827_v29, %v1827_v29  ;;  %v684_v5 = vmul.f32 0.7978846, %v668_v52 }
 0x102   : > { %v718_v28 = vmul.f32 0.5, %v702_v13  ;;  %930 = vmatpush.bf16.msrb.mxu2 %v1281_v32  ;;  %v720_v52 = vmul.f32 0.5, %v704_v30  ;;  %v1279_v13 = vld [vmem:[#allocation7 + $0x20] sm:$0xff]  ;;  %v1278_v30 = vld [vmem:[#allocation7 + $0x18] sm:$0xff] }
 0x103   : > { %v675_v46 = vmul.f32 0.7978846, %v659_v35  ;;  %v612_v47 = vmul.f32 %v1832_v38, %v1832_v38  ;;  %v637_v48 = vmul.f32 %v621_v41, %v1827_v29 }
 0x104   : > { %v734_v50 = vmul.f32 %v718_v28, %v1756_v4 }
 0x105   : > { %v628_v53 = vmul.f32 %v612_v47, %v1832_v38  ;;  %v653_v54 = vmul.f32 0.044715, %v637_v48  ;;  %1381 = vtanh.f32 %v675_v46 }
 0x106   : > { %v534_v58 = vpop.f32.mrf.mxu0  ;;  %1383 = vtanh.f32 %v671_v49 }
 0x107   : > { %v644_v59 = vmul.f32 0.044715, %v628_v53  ;;  %v669_v60 = vadd.f32 %v653_v54, %v1827_v29  ;;  %v535_v61 = vadd.f32 %v1753_v0, %v534_v58  ;;  %v583_v63 = vpop.f32.mrf.mxu1  ;;  %1385 = vtanh.f32 %v674_v51  ;;  %v1280_v54 = vld [vmem:[#allocation7 + $0x28] sm:$0xff] }
 0x108   : > { %1387 = vtanh.f32 %v681_v55  ;;  %v712_v51 = vadd.f32 1.0, %v1376_v3  ;;  %931 = vmatpush.bf16.msrb.mxu2 %v1280_v54  ;;  %v1276_v54 = vld [vmem:[#allocation7 + $0x8] sm:$0xff] }
 0x109   : > { %v660_v6 = vadd.f32 %v644_v59, %v1832_v38  ;;  %v1847_v7 = vadd.f32 %v583_v63, %v535_v61  ;;  %v685_v9 = vmul.f32 0.7978846, %v669_v60  ;;  %1389 = vtanh.f32 %v682_v56 }
 0x10a   : > { %1391 = vtanh.f32 %v683_v2  ;;  %v737_v60 = vmul.f32 %v721_v43, %v1764_v22  ;;  %v728_v8 = vmul.f32 0.5, %v712_v51 }
 0x10b   : > { %v676_v10 = vmul.f32 0.7978846, %v660_v6  ;;  %v613_v11 = vmul.f32 %v1847_v7, %v1847_v7  ;;  %v1382_v15 = vpop.eup %1381  ;;  %1393 = vtanh.f32 %v684_v5 }
 0x10c   : > { %v1384_v17 = vpop.eup %1383  ;;  %1395 = vtanh.f32 %v685_v9  ;;  %v707_v31 = vadd.f32 1.0, %v1382_v15  ;;  %v736_v9 = vmul.f32 %v720_v52, %v1769_v27  ;;  %932 = vmatpush.bf16.msrb.mxu2 %v1279_v13  ;;  %v744_v32 = vmul.f32 %v728_v8, %v1761_v20 }
 0x10d   : > { %v629_v16 = vmul.f32 %v613_v11, %v1847_v7  ;;  %v1386_v21 = vpop.eup %1385  ;;  %1397 = vtanh.f32 %v676_v10  ;;  %v703_v35 = vadd.f32 1.0, %v1384_v17 }
 0x10e   : > { %v537_v19 = vpop.f32.mrf.mxu0  ;;  %v1388_v26 = vpop.eup %1387  ;;  %v706_v44 = vadd.f32 1.0, %v1386_v21  ;;  %v723_v53 = vmul.f32 0.5, %v707_v31  ;;  %v757_v17 = vadd.f32 %v737_v60, %v736_v9 }
 0x10f   : > { %v645_v23 = vmul.f32 0.044715, %v629_v16  ;;  %v538_v24 = vadd.f32 %v1753_v0, %v537_v19  ;;  %v586_v25 = vpop.f32.mrf.mxu1  ;;  %v1390_v34 = vpop.eup %1389  ;;  %v719_v56 = vmul.f32 0.5, %v703_v35  ;;  %v713_v58 = vadd.f32 1.0, %v1388_v26 }
 0x110   : > { %v1392_v42 = vpop.eup %1391  ;;  %v714_v61 = vadd.f32 1.0, %v1390_v34  ;;  %v722_v63 = vmul.f32 0.5, %v706_v44  ;;  %v739_v10 = vmul.f32 %v723_v53, %v1810_v62  ;;  %v758_v35 = vrot.slane %v757_v17, 4  ;;  %933 = vmatpush.bf16.msrb.mxu2 %v1278_v30  ;;  %v1277_v44 = vld [vmem:[#allocation7 + $0x10] sm:$0xff] }
 0x111   : > { %v661_v37 = vadd.f32 %v645_v23, %v1847_v7  ;;  %v1854_v41 = vadd.f32 %v586_v25, %v538_v24  ;;  %v1394_v46 = vpop.eup %1393  ;;  %v715_v1 = vadd.f32 1.0, %v1392_v42  ;;  %v735_v22 = vmul.f32 %v719_v56, %v1775_v33 }
 0x112   : > { %v1396_v49 = vpop.eup %1395  ;;  %v716_v5 = vadd.f32 1.0, %v1394_v46  ;;  %v729_v14 = vmul.f32 0.5, %v713_v58  ;;  %v730_v18 = vmul.f32 0.5, %v714_v61  ;;  %v738_v19 = vmul.f32 %v722_v63, %v1780_v36 }
 0x113   : > { %v677_v47 = vmul.f32 0.7978846, %v661_v37  ;;  %v614_v48 = vmul.f32 %v1854_v41, %v1854_v41  ;;  %v1398_v55 = vpop.eup %1397  ;;  %v717_v6 = vadd.f32 1.0, %v1396_v49  ;;  %v1577_v25 = vmov 16.0  }
 0x114   : > { %v708_v11 = vadd.f32 1.0, %v1398_v55  ;;  %v732_v27 = vmul.f32 0.5, %v716_v5  ;;  %v764_v33 = vadd.f32 %v739_v10, %v738_v19  ;;  %v750_v31 = vadd.f32 %v735_v22, %v734_v50  ;;  %934 = vmatpush.bf16.msrb.mxu2 %v1277_v44 }
 0x115   : > { %1399 = vtanh.f32 %v677_v47  ;;  %v630_v59 = vmul.f32 %v614_v48, %v1854_v41  ;;  %v733_v23 = vmul.f32 0.5, %v717_v6  ;;  %v745_v36 = vmul.f32 %v729_v14, %v1785_v39 }
 0x116   : > { %v539_v2 = vpop.f32.mrf.mxu0  ;;  %1401 = vrcp.f32 %v1577_v25  ;;  %v724_v26 = vmul.f32 0.5, %v708_v11  ;;  %v746_v37 = vmul.f32 %v730_v18, %v1787_v40  ;;  %v748_v46 = vmul.f32 %v732_v27, %v1804_v57 }
 0x117   : > { %v646_v4 = vmul.f32 0.044715, %v630_v59  ;;  %v540_v3 = vadd.f32 %v1753_v0, %v539_v2  ;;  %v588_v12 = vpop.f32.mrf.mxu1  ;;  %v731_v0 = vmul.f32 0.5, %v715_v1  ;;  %v749_v47 = vmul.f32 %v733_v23, %v1827_v29  ;;  %v1275_v1 = vld [vmem:[#allocation7] sm:$0xff] }
 0x118   : > { %v765_v49 = vrot.slane %v764_v33, 4  ;;  %v740_v20 = vmul.f32 %v724_v26, %v1832_v38  ;;  %v751_v50 = vrot.slane %v750_v31, 4  ;;  %v785_v51 = vadd.f32 %v745_v36, %v744_v32  ;;  %935 = vmatpush.bf16.msrb.mxu2 %v1276_v54 }
 0x119   : > { %v662_v15 = vadd.f32 %v646_v4, %v1854_v41  ;;  %v1866_v16 = vadd.f32 %v588_v12, %v540_v3  ;;  %v747_v42 = vmul.f32 %v731_v0, %v1795_v45  ;;  %v759_v55 = vadd.f32 %v758_v35, %v757_v17 }
 0x11a   : > { %v799_v57 = vadd.f32 %v749_v47, %v748_v46  ;;  %v766_v29 = vadd.f32 %v765_v49, %v764_v33  ;;  %v752_v60 = vadd.f32 %v751_v50, %v750_v31  ;;  %v786_v61 = vrot.slane %v785_v51, 4 }
 0x11b   : > { %v1400_v21 = vpop.eup %1399  ;;  %v678_v62 = vmul.f32 0.7978846, %v662_v15  ;;  %v615_v24 = vmul.f32 %v1866_v16, %v1866_v16  ;;  %v792_v45 = vadd.f32 %v747_v42, %v746_v37  ;;  %v760_v2 = vrot.slane %v759_v55, 2 }
 0x11c   : > { %v709_v28 = vadd.f32 1.0, %v1400_v21  ;;  %v1402_v52 = vpop.eup %1401  ;;  %v800_v5 = vrot.slane %v799_v57, 4  ;;  %v767_v6 = vrot.slane %v766_v29, 2  ;;  %v753_v3 = vrot.slane %v752_v60, 2  ;;  %936 = vmatpush.bf16.msrb.mxu2 %v1275_v1 }
 0x11d   : > { %v631_v34 = vmul.f32 %v615_v24, %v1866_v16  ;;  %1403 = vtanh.f32 %v678_v62  ;;  %v807_v38 = vmul.f32 16.0, %v1402_v52  ;;  %v787_v8 = vadd.f32 %v786_v61, %v785_v51 }
 0x11e   : > { %v725_v43 = vmul.f32 0.5, %v709_v28  ;;  %v761_v13 = vadd.f32 %v760_v2, %v759_v55  ;;  %v801_v22 = vadd.f32 %v800_v5, %v799_v57  ;;  %v768_v14 = vadd.f32 %v767_v6, %v766_v29 }
 0x11f   : > { %v647_v48 = vmul.f32 0.044715, %v631_v34  ;;  %v808_v10 = vsub.f32 1.0, %v807_v38  ;;  %v754_v18 = vadd.f32 %v753_v3, %v752_v60  ;;  %v788_v19 = vrot.slane %v787_v8, 2 }
 0x120   : > { %v741_v39 = vmul.f32 %v725_v43, %v1847_v7  ;;  %v793_v7 = vrot.slane %v792_v45, 4  ;;  %v762_v62 = vrot.slane %v761_v13, 1  ;;  %v802_v24 = vrot.slane %v801_v22, 2 }
 0x121   : > { %v663_v40 = vadd.f32 %v647_v48, %v1866_v16  ;;  %v809_v21 = vmul.f32 %v1402_v52, %v808_v10  ;;  %v769_v25 = vrot.slane %v768_v14, 1  ;;  %v755_v28 = vrot.slane %v754_v18, 1 }
 0x122   : > { %v771_v53 = vadd.f32 %v741_v39, %v740_v20  ;;  %v794_v11 = vadd.f32 %v793_v7, %v792_v45  ;;  %v789_v30 = vadd.f32 %v788_v19, %v787_v8  ;;  %vm811_vm0 = vweird.f32 %v1402_v52 }
 0x123   : > { %v679_v56 = vmul.f32 0.7978846, %v663_v40  ;;  %v1404_v59 = vpop.eup %1403  ;;  %v810_v32 = vadd.f32 %v1402_v52, %v809_v21  ;;  %v763_v35 = vadd.f32 %v762_v62, %v761_v13  ;;  %v803_v37 = vadd.f32 %v802_v24, %v801_v22  ;;  %v1372_v21 = vld [vmem:[%s1924_s4] ss:$0 sm:$0xff] }
 0x124   : > { %v772_v58 = vrot.slane %v771_v53, 4  ;;  %v710_v4 = vadd.f32 1.0, %v1404_v59  ;;  %v795_v27 = vrot.slane %v794_v11, 2  ;;  %v770_v42 = vadd.f32 %v769_v25, %v768_v14 }
 0x125   : > { %1405 = vtanh.f32 %v679_v56  ;;  %v756_v44 = vadd.f32 %v755_v28, %v754_v18  ;;  %v790_v46 = vrot.slane %v789_v30, 1  ;;  %v812_v48 = vsel %vm811_vm0, %v1402_v52, %v810_v32 }
 0x126   : > { %v773_v63 = vadd.f32 %v772_v58, %v771_v53  ;;  %v726_v15 = vmul.f32 0.5, %v710_v4  ;;  %v796_v36 = vadd.f32 %v795_v27, %v794_v11  ;;  %v804_v39 = vrot.slane %v803_v37, 1 }
 0x127   : > { %v813_v51 = vmul.f32 %v812_v48, %v756_v44  ;;  %v791_v45 = vadd.f32 %v790_v46, %v789_v30 }
 0x128   : > { %v774_v9 = vrot.slane %v773_v63, 2  ;;  %v742_v33 = vmul.f32 %v726_v15, %v1854_v41  ;;  %v797_v20 = vrot.slane %v796_v36, 1  ;;  %v814_v41 = vmul.f32 %v812_v48, %v763_v35 }
 0x129   : > { %v805_v57 = vadd.f32 %v804_v39, %v803_v37  ;;  %v821_v58 = vpack.c.bf16 %v813_v51, %v813_v51  ;;  %v818_v59 = vmul.f32 %v812_v48, %v791_v45 }
 0x12a   : > { %v775_v0 = vadd.f32 %v774_v9, %v773_v63  ;;  %v798_v54 = vadd.f32 %v797_v20, %v796_v36  ;;  %v822_v55 = vpack.c.bf16 %v814_v41, %v814_v41 }
 0x12b   : > { %v1406_v12 = vpop.eup %1405  ;;  %v820_v7 = vmul.f32 %v812_v48, %v805_v57  ;;  %v857_v2 = vunpack.c.l.b16 %v821_v58  ;;  %v826_v5 = vpack.c.bf16 %v818_v59, %v818_v59 }
 0x12c   : > { %v711_v17 = vadd.f32 1.0, %v1406_v12  ;;  %v776_v31 = vrot.slane %v775_v0, 1  ;;  %v819_v52 = vmul.f32 %v812_v48, %v798_v54  ;;  %v858_v38 = vunpack.c.l.b16 %v822_v55 }
 0x12d   : > { %v828_v8 = vpack.c.bf16 %v820_v7, %v820_v7  ;;  %v862_v12 = vunpack.c.l.b16 %v826_v5 }
 0x12e   : > { %v727_v23 = vmul.f32 0.5, %v711_v17  ;;  %v777_v47 = vadd.f32 %v776_v31, %v775_v0  ;;  %v827_v3 = vpack.c.bf16 %v819_v52, %v819_v52  ;;  %v866_v9 = vsel %vm865_vm1, %v858_v38, %v857_v2 }
 0x12f   : > { %v864_v15 = vunpack.c.l.b16 %v828_v8 }
 0x130   : > { %v743_v26 = vmul.f32 %v727_v23, %v1866_v16  ;;  %v815_v16 = vmul.f32 %v812_v48, %v770_v42  ;;  %v816_v40 = vmul.f32 %v812_v48, %v777_v47  ;;  %v863_v22 = vunpack.c.l.b16 %v827_v3 }
 0x132   : > { %v778_v34 = vadd.f32 %v743_v26, %v742_v33  ;;  %v823_v56 = vpack.c.bf16 %v815_v16, %v815_v16  ;;  %v824_v60 = vpack.c.bf16 %v816_v40, %v816_v40 }
 0x134   : > { %v779_v43 = vrot.slane %v778_v34, 4  ;;  %v859_v63 = vunpack.c.l.b16 %v823_v56  ;;  %v860_v6 = vunpack.c.l.b16 %v824_v60 }
 0x136   : > { %v780_v49 = vadd.f32 %v779_v43, %v778_v34  ;;  %v868_v11 = vsel %vm867_vm2, %v859_v63, %v866_v9 }
 0x137   : > { %v870_v13 = vsel %vm869_vm3, %v860_v6, %v868_v11 }
 0x138   : > { %v781_v50 = vrot.slane %v780_v49, 2 }
 0x13a   : > { %v782_v53 = vadd.f32 %v781_v50, %v780_v49 }
 0x13c   : > { %v783_v29 = vrot.slane %v782_v53, 1 }
 0x13e   : > { %v784_v61 = vadd.f32 %v783_v29, %v782_v53 }
 0x140   : > { %v817_v1 = vmul.f32 %v812_v48, %v784_v61 }
 0x142   : > { %v825_v4 = vpack.c.bf16 %v817_v1, %v817_v1 }
 0x144   : > { %v861_v10 = vunpack.c.l.b16 %v825_v4 }
 0x146   : > { %v872_v14 = vsel %vm871_vm4, %v861_v10, %v870_v13 }
 0x147   : > { %v874_v17 = vsel %vm873_vm5, %v862_v12, %v872_v14 }
 0x148   : > { %v876_v18 = vsel %vm875_vm6, %v863_v22, %v874_v17 }
 0x149   : > { %v878_v19 = vsel %vm877_vm7, %v864_v15, %v876_v18 }
 0x14a   : > { %v879_v0 = vpack.c.b16 %v878_v19, %v878_v19 }
 0x14c   : > { %937 = vmatmul.bf16.vlgmr.msrb.gmra.mxu2 %v879_v0 }
 0x1cf   : > { %v938_v27 = vpop.f32.mrf.mxu2 }
 0x1d0   : > { %v939_v23 = vadd.f32 %v1372_v21, %v938_v27 }
 0x1d2   : > { %v942_v62 = vmul.f32 %v939_v23, %v939_v23 }
 0x1d4   : > { %943 = vadd.xlane.f32.xlu0 %v942_v62 }
 0x1d7   : > { %v940_v24 = vpop.f32.mrf.mxu2 }
 0x247   : > { %v944_v25 = vpop.xlane.xlu0 %943 }
 0x248   : > { %v945_v33 = vmax.f32 %v944_v25, 1e-24 }
 0x24a   : > { %1407 = vrsqrt.f32 %v945_v33  ;;  %vm952_vm9 = vweird.f32 %v945_v33 }
 0x250   : > { %v1408_v26 = vpop.eup %1407 }
 0x251   : > { %v947_v28 = vmul.f32 %v1408_v26, %v945_v33  ;;  %vm953_vm8 = vweird.f32 %v1408_v26 }
 0x252   : > { %vm954_vm10 = vmor %vm952_vm9, %vm953_vm8 }
 0x253   : > { %v948_v30 = vmul.f32 %v1408_v26, %v947_v28 }
 0x255   : > { %v949_v31 = vmul.f32 0.5, %v948_v30 }
 0x257   : > { %v950_v32 = vsub.f32 1.5, %v949_v31 }
 0x259   : > { %v951_v36 = vmul.f32 %v1408_v26, %v950_v32 }
 0x25b   : > { %v955_v34 = vsel %vm954_vm10, %v1408_v26, %v951_v36 }
 0x25c   : > { %v956_v35 = vmul.f32 %v955_v34, %v939_v23 }
 0x25e   : > { %957 = vst [vmem:[%s278_s6] sm:$0xff] %v956_v35 }
 0x25f   : > { %1526 = shalt.err (!%p1523_p10)
}
 0x260   : > { %1309 = dma.vmem_to_hbm [thread:$0]  (%p1674_p3), %s972_s26, 128, %s974_s7, %s959_s22  }
 0x261 PF: > { %s985_s8 = sand.u32 1, %s1557_s18   ;;  %p1931_p12 = scmp.ge.s32.totalorder %s1569_s21, 2 }
 0x262   : > { %s986_s11 = scalar_lea.sflag [#allocation4], %s985_s8 }
 0x263   : > { %p1323_p13 = pnand %p1931_p12, %p1643_p6 }
 0x265   : > { %p1324_p0 = pneg %p1323_p13 }
 0x267   : > { %1552 = dma.done.wait (%p1324_p0), %s986_s11, 128  }
 0x268   : > { %1554 = vsyncadd (%p1324_p0), %s986_s11, 4294967168  ;;  %p19_p5 = scmp.ge.s32.totalorder %s1664_s14, 4   ;;  %s1932_s18 = smov %s1561_s19 }
 0x269   : > { %s1933_s19 = smov %s1565_s20  ;;  %s1934_s20 = smov %s1680_s23 }
 0x26a   : > { %s1935_s21 = smov %s1664_s14  ;;  %21 = sbr.rel (!%p19_p5) target bundleno = 6 (0x6), region = 93 }
 0x26f   :  { %992 = vsyncpa [#allocation3], 1 }
 0x270   :  { %994 = vsyncpa [#allocation3 + $0x1], 1 }
 0x271   :  { %995 = vsyncpa [#allocation6], 1 }
 0x272   :  { %996 = vsyncpa [#allocation4], 1 }
 0x273   :  { %998 = vsyncpa [#allocation4 + $0x1], 1 }

</bundles_post_ra>
